<compile_context>
chip_gen: v7x
topology: tpu7x:2x2x1
jax: 0.10.0
libtpu: 0.0.40
codegen_flags: <defaults>
</compile_context>

<pallas_src>
import jax
import jax.numpy as jnp
from jax import lax
from jax.experimental import pallas as pl
from jax.experimental.pallas import tpu as pltpu


_EPS = 1e-12            # matches torch.nn.functional.normalize default eps
_EPS2 = _EPS * _EPS


def _round_up(x, m):
    return (x + m - 1) // m * m


def _physical_vmem_bytes():
    """Physical VMEM per core; conservative (v7x, 64 MiB) fallback."""
    try:
        v = getattr(pltpu.get_tpu_info(), "vmem_capacity_bytes", None)
        if v:
            return int(v)
    except Exception:
        pass
    return 64 * 1024 * 1024


def _vmem_limit(estimate_bytes, budget_bytes):
    # Request ~2x the static estimate (headroom for compiler scratch / spills),
    # but stay below physical capacity so pipelining is never forcibly squeezed.
    return int(min(budget_bytes, max(32 * 1024 * 1024, 2 * estimate_bytes)))


# ----------------------------- kernels --------------------------------------


def _proj_norm_kernel(x_ref, w_ref, b_ref, o_ref):
    """Linear projection + L2 normalize for one batch tile.

    Operands are cast to the weight dtype (bf16 by default) for the MXU;
    accumulation, bias add and the normalize stay in f32.
    """
    x = x_ref[...].astype(w_ref.dtype)
    y = jnp.dot(x, w_ref[...], preferred_element_type=jnp.float32) + b_ref[...]
    # F.normalize: x / max(||x||, eps) == x * rsqrt(max(sum(x^2), eps^2))
    inv = lax.rsqrt(jnp.maximum(jnp.sum(y * y, axis=-1, keepdims=True), _EPS2))
    o_ref[...] = (y * inv).astype(o_ref.dtype)


def _img_proj_sim_kernel(cls_ref, w_ref, b_ref, txt_ref, pimg_ref, sim_ref):
    """Image projection + normalize + similarity row block vs the VMEM-resident
    normalized text matrix.

    The dot_general contracts the LAST dim of BOTH operands (an NT matmul the
    MXU consumes directly).  NOTE(review): verified intent is that Mosaic feeds
    the transposed operand to the MXU rather than inserting a per-step vxpose;
    check with pl.lower_as_mlir if this is ever in doubt.
    """
    x = cls_ref[...].astype(w_ref.dtype)
    y = jnp.dot(x, w_ref[...], preferred_element_type=jnp.float32) + b_ref[...]
    inv = lax.rsqrt(jnp.maximum(jnp.sum(y * y, axis=-1, keepdims=True), _EPS2))
    img_n = y * inv
    pimg_ref[...] = img_n.astype(pimg_ref.dtype)
    sim = lax.dot_general(
        img_n.astype(txt_ref.dtype), txt_ref[...],
        dimension_numbers=(((1,), (1,)), ((), ())),
        preferred_element_type=jnp.float32)
    sim_ref[...] = sim.astype(sim_ref.dtype)


def _img_proj_sim_tiled_kernel(cls_ref, w_ref, b_ref, txt_ref,
                               pimg_ref, sim_ref, img_mm_ref):
    """2-D tiled similarity: grid = (image row tiles i, text row tiles j).

    The image projection + normalize runs once per i (at j == 0) into VMEM
    scratch; every j step is then a pure (blk_i, P) x (P, blk_j) MXU matmul.
    VMEM footprint is O(tile sizes), independent of B (v7x / large-B path).
    """
    @pl.when(pl.program_id(1) == 0)
    def _():
        x = cls_ref[...].astype(w_ref.dtype)
        y = jnp.dot(x, w_ref[...], preferred_element_type=jnp.float32) + b_ref[...]
        inv = lax.rsqrt(jnp.maximum(jnp.sum(y * y, axis=-1, keepdims=True), _EPS2))
        img_n = y * inv
        pimg_ref[...] = img_n.astype(pimg_ref.dtype)
        img_mm_ref[...] = img_n.astype(img_mm_ref.dtype)

    sim = lax.dot_general(
        img_mm_ref[...], txt_ref[...],
        dimension_numbers=(((1,), (1,)), ((), ())),
        preferred_element_type=jnp.float32)
    sim_ref[...] = sim.astype(sim_ref.dtype)


# ----------------------------- wrapper ---------------------------------------


def itc_head(cls_token, start_token, w_img, b_img, w_txt, b_txt, *,
             block_b=512, block_bt=512,
             matmul_dtype=jnp.bfloat16, sim_dtype=jnp.float32,
             force_tiled_sim=None):
    """ITC head forward (matches ITCHead.forward).

    Args:
        cls_token:   (B, H_img) image [CLS] features.
        start_token: (B, H_txt) text  [START] features.
        w_img: (H_img, P), b_img: (P,)   -- transpose of nn.Linear weight.
        w_txt: (H_txt, P), b_txt: (P,)
        block_b:  batch rows per grid step.
        block_bt: text-column tile (multiple of 128) for the 2-D tiled-sim path.
        matmul_dtype: MXU operand dtype (default bf16; accumulation stays f32).
            projected_text is materialized in this dtype (it doubles as the
            resident similarity operand) and upcast to f32 on return.  Pass
            jnp.float32 for bit-exact outputs.
        sim_dtype: similarity matrix dtype (f32 default; bf16 halves the
            dominant HBM writeback at large B).
        force_tiled_sim: None = auto (VMEM-footprint based), True/False = force.

    Returns:
        (projected_image (B, P) f32, projected_text (B, P) f32,
         similarity (B, B) sim_dtype)
    """
    B, H_img = cls_token.shape
    Bt, H_txt = start_token.shape
    assert Bt == B, "cls_token and start_token must share the batch dimension"
    P = w_img.shape[1]
    assert w_img.shape == (H_img, P) and w_txt.shape == (H_txt, P)
    assert b_img.shape == (P,) and b_txt.shape == (P,)

    f32 = jnp.float32
    mm_dtype = jnp.dtype(matmul_dtype)
    sim_dtype = jnp.dtype(sim_dtype)
    mm_bytes = mm_dtype.itemsize
    sim_bytes = sim_dtype.itemsize
    act_i_bytes = jnp.dtype(cls_token.dtype).itemsize
    act_t_bytes = jnp.dtype(start_token.dtype).itemsize

    # Lane-dense projection dim and sim columns (multiples of 128) -> unmasked
    # vector stores.  Zero-padded weight/bias columns and zero text rows are
    # numerically inert and sliced off at the end.
    P_pad = _round_up(P, 128)
    Bt_pad = _round_up(B, 128)

    def pad2(x, rows, cols):
        pr, pc = rows - x.shape[0], cols - x.shape[1]
        return x if (pr == 0 and pc == 0) else jnp.pad(x, ((0, pr), (0, pc)))

    # Weights / biases: cast + pad once in the wrapper (read once per pass).
    wi = pad2(w_img.astype(mm_dtype), H_img, P_pad)
    wt = pad2(w_txt.astype(mm_dtype), H_txt, P_pad)
    bi = pad2(b_img.astype(f32).reshape(1, P), 1, P_pad)
    bt = pad2(b_txt.astype(f32).reshape(1, P), 1, P_pad)

    # Activations are NOT copied/cast in the wrapper:
    #   * cls_token is consumed unpadded via a cdiv grid (ragged last tile;
    #     garbage rows only land in output rows that are dropped).
    #   * start_token only gets the <=127 zero rows needed for lane-dense sim
    #     columns; those rows land in sim columns >= B and are sliced off.
    start_p = start_token if Bt_pad == B else jnp.pad(
        start_token, ((0, Bt_pad - B), (0, 0)))

    budget = int(0.8 * _physical_vmem_bytes())   # ~51 MiB v7x, ~102 MiB v5e/v6e

    # ---------------- pass 1: text projection + normalize -------------------
    blk_t = max(8, min(_round_up(block_b, 8), Bt_pad))
    est_txt = (2 * blk_t * H_txt * act_t_bytes     # input tile (double-buffered)
               + 2 * H_txt * P_pad * mm_bytes      # weights (constant index map)
               + 2 * P_pad * 4                     # bias
               + 2 * blk_t * P_pad * mm_bytes      # output tile
               + 3 * blk_t * P_pad * 4)            # f32 intermediates / spill
    txt_n = pl.pallas_call(
        _proj_norm_kernel,
        out_shape=jax.ShapeDtypeStruct((Bt_pad, P_pad), mm_dtype),
        grid=(pl.cdiv(Bt_pad, blk_t),),
        in_specs=[
            pl.BlockSpec((blk_t, H_txt), lambda i: (i, 0)),
            pl.BlockSpec((H_txt, P_pad), lambda i: (0, 0)),   # VMEM-resident
            pl.BlockSpec((1, P_pad), lambda i: (0, 0)),       # VMEM-resident
        ],
        out_specs=pl.BlockSpec((blk_t, P_pad), lambda i: (i, 0)),
        compiler_params=pltpu.CompilerParams(
            dimension_semantics=("parallel",),
            vmem_limit_bytes=_vmem_limit(est_txt, budget)),
    )(start_p, wt, bt)

    # --------- pass 2: image projection + normalize + similarity ------------
    blk_i = max(8, min(_round_up(block_b, 8), _round_up(B, 8)))

    def est_resident(blk):
        # Constant-index_map blocks are conservatively counted at 2 buffers;
        # if the resident text matrix no longer fits we fall back to the 2-D
        # tiled path instead of relying on single-buffering.
        return (2 * H_img * P_pad * mm_bytes + 2 * P_pad * 4
                + 2 * Bt_pad * P_pad * mm_bytes        # resident normalized text
                + 2 * blk * H_img * act_i_bytes
                + 2 * blk * P_pad * 4                  # projected-image tile
                + 2 * blk * Bt_pad * sim_bytes         # sim row block
                + blk * Bt_pad * 4                     # f32 sim intermediate
                + 3 * blk * P_pad * 4)

    use_tiled = force_tiled_sim
    if use_tiled is None:
        while est_resident(blk_i) > budget and blk_i > 64:
            blk_i = max(64, _round_up(blk_i // 2, 8))
        use_tiled = est_resident(blk_i) > budget
    use_tiled = bool(use_tiled)

    out_shapes = (jax.ShapeDtypeStruct((B, P_pad), f32),
                  jax.ShapeDtypeStruct((B, Bt_pad), sim_dtype))

    if not use_tiled:
        # Whole normalized-text matrix VMEM-resident; sim emitted in
        # lane-dense (blk_i, Bt_pad) row blocks.
        pimg, sim = pl.pallas_call(
            _img_proj_sim_kernel,
            out_shape=out_shapes,
            grid=(pl.cdiv(B, blk_i),),
            in_specs=[
                pl.BlockSpec((blk_i, H_img), lambda i: (i, 0)),
                pl.BlockSpec((H_img, P_pad), lambda i: (0, 0)),    # resident
                pl.BlockSpec((1, P_pad), lambda i: (0, 0)),        # resident
                pl.BlockSpec((Bt_pad, P_pad), lambda i: (0, 0)),   # resident txt
            ],
            out_specs=(pl.BlockSpec((blk_i, P_pad), lambda i: (i, 0)),
                       pl.BlockSpec((blk_i, Bt_pad), lambda i: (i, 0))),
            compiler_params=pltpu.CompilerParams(
                dimension_semantics=("parallel",),
                vmem_limit_bytes=_vmem_limit(est_resident(blk_i), budget)),
        )(cls_token, wi, bi, txt_n)
    else:
        # Large-B / small-VMEM (v7x) path: 2-D grid (image tiles x text tiles).
        blk_j = max(128, min(_round_up(block_bt, 128), Bt_pad))

        def est_tiled(bi_, bj_):
            return (2 * H_img * P_pad * mm_bytes + 2 * P_pad * 4
                    + 2 * bj_ * P_pad * mm_bytes
                    + 2 * bi_ * H_img * act_i_bytes
                    + 2 * bi_ * P_pad * 4
                    + 2 * bi_ * bj_ * sim_bytes
                    + bi_ * P_pad * mm_bytes           # img scratch
                    + bi_ * bj_ * 4                    # f32 sim intermediate
                    + 3 * bi_ * P_pad * 4)

        while est_tiled(blk_i, blk_j) > budget and blk_j > 128:
            blk_j = max(128, _round_up(blk_j // 2, 128))
        while est_tiled(blk_i, blk_j) > budget and blk_i > 64:
            blk_i = max(64, _round_up(blk_i // 2, 8))

        pimg, sim = pl.pallas_call(
            _img_proj_sim_tiled_kernel,
            out_shape=out_shapes,
            grid=(pl.cdiv(B, blk_i), pl.cdiv(Bt_pad, blk_j)),
            in_specs=[
                pl.BlockSpec((blk_i, H_img), lambda i, j: (i, 0)),   # revisited
                pl.BlockSpec((H_img, P_pad), lambda i, j: (0, 0)),   # resident
                pl.BlockSpec((1, P_pad), lambda i, j: (0, 0)),       # resident
                pl.BlockSpec((blk_j, P_pad), lambda i, j: (j, 0)),   # txt tile
            ],
            out_specs=(pl.BlockSpec((blk_i, P_pad), lambda i, j: (i, 0)),
                       pl.BlockSpec((blk_i, blk_j), lambda i, j: (i, j))),
            scratch_shapes=[pltpu.VMEM((blk_i, P_pad), mm_dtype)],
            compiler_params=pltpu.CompilerParams(
                dimension_semantics=("parallel", "arbitrary"),
                vmem_limit_bytes=_vmem_limit(est_tiled(blk_i, blk_j), budget)),
        )(cls_token, wi, bi, txt_n)

    projected_image = pimg if P_pad == P else pimg[:, :P]
    projected_text = txt_n[:B, :P].astype(f32)
    similarity = sim if Bt_pad == B else sim[:, :B]
    return projected_image, projected_text, similarity


# ----------------------------- reference & test ------------------------------


def _reference(cls_token, start_token, w_img, b_img, w_txt, b_txt):
    def _norm(x):
        n = jnp.sqrt(jnp.sum(x * x, axis=-1, keepdims=True))
        return x / jnp.maximum(n, _EPS)
    pi = _norm(cls_token @ w_img + b_img)
    pt = _norm(start_token @ w_txt + b_txt)
    return pi, pt, pi @ pt.T


def _make_inputs(key, B, H_img, H_txt, P):
    k1, k2, k3, k4, k5, k6 = jax.random.split(key, 6)
    cls_token = jax.random.normal(k1, (B, H_img), dtype=jnp.float32)
    start_token = jax.random.normal(k2, (B, H_txt), dtype=jnp.float32)
    w_img = jax.random.normal(k3, (H_img, P), dtype=jnp.float32) * 0.05
    b_img = jax.random.normal(k4, (P,), dtype=jnp.float32) * 0.01
    w_txt = jax.random.normal(k5, (H_txt, P), dtype=jnp.float32) * 0.05
    b_txt = jax.random.normal(k6, (P,), dtype=jnp.float32) * 0.01
    return cls_token, start_token, w_img, b_img, w_txt, b_txt


def _check(outs, refs, atol):
    for got, want in zip(outs, refs):
        assert got.shape == want.shape, (got.shape, want.shape)
        err = float(jnp.max(jnp.abs(got.astype(jnp.float32) - want)))
        assert err <= atol, f"max abs err {err} > {atol}"


if __name__ == "__main__":
    # Test 1: small shapes, fused resident-text path (default bf16 operands).
    B, H_IMG, H_TXT, PROJ = 8, 32, 48, 64
    args = _make_inputs(jax.random.PRNGKey(0), B, H_IMG, H_TXT, PROJ)
    refs = _reference(*args)

    out_bf16 = itc_head(*args)
    jax.block_until_ready(out_bf16)
    assert out_bf16[0].shape == (B, PROJ)
    assert out_bf16[1].shape == (B, PROJ)
    assert out_bf16[2].shape == (B, B)
    _check(out_bf16, refs, atol=2e-2)          # bf16-operand tolerance

    out_f32 = itc_head(*args, matmul_dtype=jnp.float32)
    jax.block_until_ready(out_f32)
    _check(out_f32, refs, atol=1e-4)           # exact fp32 path

    # Test 2: B > block_b and B not a multiple of the tile, forced 2-D
    # tiled-similarity path (the large-B / v7x configuration): exercises
    # multi-step grids, ragged last tiles, and the pl.when(j == 0)
    # projection-into-scratch path.
    B2 = 200
    args2 = _make_inputs(jax.random.PRNGKey(1), B2, H_IMG, H_TXT, PROJ)
    refs2 = _reference(*args2)
    out2 = itc_head(*args2, block_b=64, block_bt=128, force_tiled_sim=True)
    jax.block_until_ready(out2)
    assert out2[2].shape == (B2, B2)
    _check(out2, refs2, atol=2e-2)

    print("KERNEL_OK")
</pallas_src>

<mosaic_0001>
module attributes {stable_mosaic.version = 11 : i64} {
  func.func @_proj_norm_kernel(%arg0: i32, %arg1: memref<128x48xf32, #tpu.memory_space<vmem>>, %arg2: memref<48x128xbf16, #tpu.memory_space<vmem>>, %arg3: memref<1x128xf32, #tpu.memory_space<vmem>>, %arg4: memref<128x128xbf16, #tpu.memory_space<vmem>>) attributes {dimension_semantics = [#tpu.dimension_semantics<parallel>], iteration_bounds = array<i64: 1>, scalar_prefetch = 0 : i64, scratch_operands = 0 : i64, tpu.core_type = #tpu.core_type<tc>, window_params = [{transform_indices = @transform_0, window_bounds = array<i64: 128, 48>}, {pipeline_mode = #tpu.pipeline_mode<synchronous>, transform_indices = @transform_1, window_bounds = array<i64: 48, 128>}, {pipeline_mode = #tpu.pipeline_mode<synchronous>, transform_indices = @transform_2, window_bounds = array<i64: 1, 128>}, {transform_indices = @transform_3, window_bounds = array<i64: 128, 128>}]} {
    %c0 = arith.constant 0 : index
    %c0_0 = arith.constant 0 : index
    %0 = vector.load %arg1[%c0, %c0_0] : memref<128x48xf32, #tpu.memory_space<vmem>>, vector<128x48xf32>
    %1 = arith.truncf %0 : vector<128x48xf32> to vector<128x48xbf16>
    %c0_1 = arith.constant 0 : index
    %c0_2 = arith.constant 0 : index
    %2 = vector.load %arg2[%c0_1, %c0_2] : memref<48x128xbf16, #tpu.memory_space<vmem>>, vector<48x128xbf16>
    %cst = arith.constant dense<0.000000e+00> : vector<128x128xf32>
    %3 = tpu.matmul %1, %2, %cst {dimension_numbers = #tpu.dot_dimension_numbers<[1], [0], [0], [1], [0, 0, 1, 1], [], []>} : vector<128x48xbf16>, vector<48x128xbf16>, vector<128x128xf32> -> vector<128x128xf32>
    %c0_3 = arith.constant 0 : index
    %c0_4 = arith.constant 0 : index
    %4 = vector.load %arg3[%c0_3, %c0_4] : memref<1x128xf32, #tpu.memory_space<vmem>>, vector<1x128xf32>
    %5 = vector.broadcast %4 : vector<1x128xf32> to vector<128x128xf32>
    %6 = arith.addf %3, %5 : vector<128x128xf32>
    %7 = arith.mulf %6, %6 : vector<128x128xf32>
    %cst_5 = arith.constant dense<0.000000e+00> : vector<128xf32>
    %8 = vector.multi_reduction <add>, %7, %cst_5 [1] : vector<128x128xf32> to vector<128xf32>
    %9 = vector.shape_cast %8 : vector<128xf32> to vector<128x1xf32>
    %cst_6 = arith.constant 1.000000e-24 : f32
    %10 = vector.broadcast %cst_6 : f32 to vector<128x1xf32>
    %11 = arith.maximumf %9, %10 : vector<128x1xf32>
    %12 = math.rsqrt %11 : vector<128x1xf32>
    %13 = vector.broadcast %12 : vector<128x1xf32> to vector<128x128xf32>
    %14 = arith.mulf %6, %13 : vector<128x128xf32>
    %15 = arith.truncf %14 : vector<128x128xf32> to vector<128x128xbf16>
    %c0_7 = arith.constant 0 : index
    %c0_8 = arith.constant 0 : index
    %16 = vector.load %arg4[%c0_7, %c0_8] : memref<128x128xbf16, #tpu.memory_space<vmem>>, vector<128x128xbf16>
    tpu.vector_store %arg4[%c0_7, %c0_8], %15 {strides = array<i32>} : memref<128x128xbf16, #tpu.memory_space<vmem>>, vector<128x128xbf16>,
    return
  }
  func.func @transform_0(%arg0: i32) -> (i32, i32) {
    %c0_i32 = arith.constant 0 : i32
    %c0_i32_0 = arith.constant 0 : i32
    return %arg0, %c0_i32 : i32, i32
  }
  func.func @transform_1(%arg0: i32) -> (i32, i32) {
    %c0_i32 = arith.constant 0 : i32
    %c0_i32_0 = arith.constant 0 : i32
    %c0_i32_1 = arith.constant 0 : i32
    return %c0_i32, %c0_i32_0 : i32, i32
  }
  func.func @transform_2(%arg0: i32) -> (i32, i32) {
    %c0_i32 = arith.constant 0 : i32
    %c0_i32_0 = arith.constant 0 : i32
    %c0_i32_1 = arith.constant 0 : i32
    return %c0_i32, %c0_i32_0 : i32, i32
  }
  func.func @transform_3(%arg0: i32) -> (i32, i32) {
    %c0_i32 = arith.constant 0 : i32
    %c0_i32_0 = arith.constant 0 : i32
    return %arg0, %c0_i32 : i32, i32
  }
}

</mosaic_0001>

<bundles_post_ra>
// kernel: tpu_custom_call.1
= control target key start
LH: loop header
LB: loop body
LE: loop exit
PB: predicated region body
PF: predicated region fallthrough
CT: control target
= control target key end

     0   :  { %vm71_vm0 = vcmask 392192   ;;  %s760_s0 = inlined_call_operand.vmem [shape: f32[128,48], index: 0, kind: input, shape index: {}]   ;;  %s761_s1 = inlined_call_operand.vmem [shape: bf16[48,128], index: 1, kind: input, shape index: {}]   ;;  %s762_s2 = inlined_call_operand.vmem [shape: f32[1,128], index: 2, kind: input, shape index: {}]   ;;  %s763_s3 = inlined_call_operand.hbm [shape: bf16[128,128], index: 3, kind: output, shape index: {}]  }
   0x1   :  { %v518_v0 = vld [vmem:[%s761_s1] sm:$0xff]   ;;  %v519_v1 = vld [vmem:[%s761_s1 + $0x8] sm:$0xff]   ;;  %v520_v5 = vld [vmem:[%s761_s1 + $0x10] sm:$0xff]  }
   0x2   :  { %487 = vmatprep.subr.bf16.mxu0 %v518_v0  ;;  %509 = vmatprep.subr.bf16.mxu1 %v518_v0  ;;  %v16_v2 = vld [vmem:[%s760_s0] sm:$0xff]  ;;  %v17_v3 = vld [vmem:[%s760_s0 + $0x8] sm:$0xff]  ;;  %v18_v9 = vld [vmem:[%s760_s0 + $0x10] sm:$0xff] }
   0x3   :  { %488 = vmatpush3.bf16.msra.mxu0 %v518_v0  ;;  %512 = vmatpush3.bf16.msra.mxu1 %v518_v0  ;;  %v24_v4 = vld [vmem:[%s760_s0 + $0x40] sm:$0xff]  ;;  %v32_v6 = vpack.c.bf16 %v17_v3, %v16_v2  ;;  %v25_v7 = vld [vmem:[%s760_s0 + $0x48] sm:$0xff]  ;;  %v19_v10 = vld [vmem:[%s760_s0 + $0x18] sm:$0xff] }
   0x4   :  { %489 = vmatprep.subr.bf16.mxu0 %v519_v1  ;;  %510 = vmatprep.subr.bf16.mxu1 %v519_v1  ;;  %v36_v8 = vpack.c.bf16 %v25_v7, %v24_v4  ;;  %v26_v11 = vld [vmem:[%s760_s0 + $0x50] sm:$0xff]  ;;  %v27_v12 = vld [vmem:[%s760_s0 + $0x58] sm:$0xff]  ;;  %v20_v13 = vld [vmem:[%s760_s0 + $0x20] sm:$0xff] }
   0x5   :  { %493 = vmatprep.mubr.msk.bf16.mxu0 %vm71_vm0, %v32_v6  ;;  %v21_v14 = vld [vmem:[%s760_s0 + $0x28] sm:$0xff]  ;;  %v28_v15 = vld [vmem:[%s760_s0 + $0x60] sm:$0xff] }
   0x6   :  { %v29_v16 = vld [vmem:[%s760_s0 + $0x68] sm:$0xff] }
   0x7   :  { %490 = vmatpush3.bf16.msra.mxu0 %v519_v1  ;;  %513 = vmatpush3.bf16.msra.mxu1 %v519_v1 }
   0x8   :  { %491 = vmatprep.subr.bf16.mxu0 %v520_v5  ;;  %511 = vmatprep.subr.bf16.mxu1 %v520_v5 }
   0x9   :  { %8 = vsyncpa [#allocation3], 0  ;;  %501 = vmatprep.mubr.msk.bf16.mxu1 %vm71_vm0, %v36_v8  ;;  %v33_v17 = vpack.c.bf16 %v19_v10, %v18_v9  ;;  %v37_v18 = vpack.c.bf16 %v27_v12, %v26_v11  ;;  %v34_v19 = vpack.c.bf16 %v21_v14, %v20_v13  ;;  %v38_v20 = vpack.c.bf16 %v29_v16, %v28_v15  ;;  %v22_v21 = vld [vmem:[%s760_s0 + $0x30] sm:$0xff]  ;;  %v23_v22 = vld [vmem:[%s760_s0 + $0x38] sm:$0xff] }
   0xa   :  { %v30_v23 = vld [vmem:[%s760_s0 + $0x70] sm:$0xff]  ;;  %v31_v24 = vld [vmem:[%s760_s0 + $0x78] sm:$0xff]  ;;  %v35_v25 = vpack.c.bf16 %v23_v22, %v22_v21  ;;  %v385_v27 = vld [vmem:[%s762_s2] ss:$0 sm:$0xff]  ;;  %s577_s0 = smov [#allocation2]  }
   0xb   :  { %492 = vmatpush3.bf16.msra.mxu0 %v520_v5  ;;  %514 = vmatpush3.bf16.msra.mxu1 %v520_v5  ;;  %v39_v26 = vpack.c.bf16 %v31_v24, %v30_v23  ;;  %s374_s2 = sshll.u32 %s577_s0, 4  ;;  %s375_s2 = int_to_ptr.vmem [resolvable:$true] %s374_s2 }
   0xc   :  { %s553_s24 = scalar_lea.vmem %s375_s2, 1024  ;;  %p558_p1 = scmp.lt.s32.totalorder %s375_s2, %s375_s2 }
   0xd   :  { %p554_p0 = scmp.ne.s32.totalorder %s375_s2, %s553_s24  ;;  %p559_p2 = scmp.lt.s32.totalorder %s553_s24, %s553_s24 }
   0xe   :  { %494 = vmatmul.mubr.msk.bf16.vlgmr.msra.gmra.mrb[0].mxu0 %vm71_vm0, %v33_v17  ;;  %502 = vmatmul.mubr.msk.bf16.vlgmr.msra.gmra.mrb[0].mxu1 %vm71_vm0, %v37_v18 }
   0xf   :  { %497 = vmatprep.mubr.msk.bf16.mxu0 %vm71_vm0, %v34_v19  ;;  %505 = vmatprep.mubr.msk.bf16.mxu1 %vm71_vm0, %v38_v20  ;;  %p560_p3 = por %p559_p2, %p558_p1 }
  0x11   :  { %p561_p4 = pnand %p560_p3, %p554_p0 }
  0x16   :  { %498 = vmatmul.mubr.msk.bf16.gmra.mrb[4].mxu0 %vm71_vm0, %v35_v25  ;;  %506 = vmatmul.mubr.msk.bf16.gmra.mrb[4].mxu1 %vm71_vm0, %v39_v26 }
  0xe1   :  { %v495_v28 = vpop.f32.mrb[0].mxu0  ;;  %v503_v29 = vpop.f32.mrb[0].mxu1 }
  0xe2   :  { %v668_v30 = vadd.f32 %v495_v28, %v385_v27  ;;  %v670_v31 = vadd.f32 %v503_v29, %v385_v27  ;;  %v130_v32 = vpop.f32.mrb[1].mxu0  ;;  %v162_v33 = vpop.f32.mrb[1].mxu1 }
  0xe3   :  { %v496_v34 = vpop.f32.mrb[2].mxu0  ;;  %v504_v35 = vpop.f32.mrb[2].mxu1  ;;  %v672_v36 = vadd.f32 %v385_v27, %v130_v32  ;;  %v680_v42 = vadd.f32 %v385_v27, %v162_v33 }
  0xe4   :  { %v674_v37 = vadd.f32 %v496_v34, %v385_v27  ;;  %v133_v38 = vpop.f32.mrb[3].mxu0  ;;  %v165_v39 = vpop.f32.mrb[3].mxu1  ;;  %v203_v40 = vmul.f32 %v670_v31, %v670_v31  ;;  %v195_v41 = vmul.f32 %v668_v30, %v668_v30  ;;  %v682_v43 = vadd.f32 %v504_v35, %v385_v27 }
  0xe5   :  { %v193_v45 = vmul.f32 %v672_v36, %v672_v36  ;;  %v688_v52 = vadd.f32 %v385_v27, %v133_v38  ;;  %v690_v53 = vadd.f32 %v385_v27, %v165_v39  ;;  %v201_v55 = vmul.f32 %v680_v42, %v680_v42 }
  0xe6   :  { %229 = vadd.xlane.f32.xlu0 %v203_v40  ;;  %213 = vadd.xlane.f32.xlu1 %v195_v41  ;;  %v196_v44 = vmul.f32 %v674_v37, %v674_v37  ;;  %v204_v54 = vmul.f32 %v682_v43, %v682_v43 }
  0xe7   :  { %v202_v60 = vmul.f32 %v690_v53, %v690_v53  ;;  %v194_v61 = vmul.f32 %v688_v52, %v688_v52 }
  0xe9   :  { %v499_v46 = vpop.f32.mrb[4].mxu0  ;;  %v507_v47 = vpop.f32.mrb[4].mxu1 }
  0xea   :  { %215 = vadd.xlane.f32.xlu1 %v196_v44  ;;  %209 = vadd.xlane.f32.xlu0 %v193_v45  ;;  %v146_v48 = vpop.f32.mrb[5].mxu0  ;;  %v178_v49 = vpop.f32.mrb[5].mxu1  ;;  %v696_v58 = vadd.f32 %v499_v46, %v385_v27  ;;  %v720_v6 = vadd.f32 %v507_v47, %v385_v27 }
  0xeb   :  { %v500_v50 = vpop.f32.mrb[6].mxu0  ;;  %v508_v51 = vpop.f32.mrb[6].mxu1  ;;  %v704_v62 = vadd.f32 %v385_v27, %v146_v48  ;;  %v712_v2 = vadd.f32 %v385_v27, %v178_v49 }
  0xec   :  { %v149_v56 = vpop.f32.mrb[7].mxu0  ;;  %v181_v57 = vpop.f32.mrb[7].mxu1  ;;  %v698_v59 = vadd.f32 %v500_v50, %v385_v27  ;;  %v199_v1 = vmul.f32 %v696_v58, %v696_v58  ;;  %v722_v7 = vadd.f32 %v508_v51, %v385_v27  ;;  %v207_v11 = vmul.f32 %v720_v6, %v720_v6 }
  0xed   :  { %v706_v63 = vadd.f32 %v385_v27, %v149_v56  ;;  %v714_v3 = vadd.f32 %v385_v27, %v181_v57  ;;  %v197_v5 = vmul.f32 %v704_v62, %v704_v62  ;;  %v205_v9 = vmul.f32 %v712_v2, %v712_v2 }
  0xee   :  { %231 = vadd.xlane.f32.xlu1 %v204_v54  ;;  %225 = vadd.xlane.f32.xlu0 %v201_v55  ;;  %v200_v0 = vmul.f32 %v698_v59, %v698_v59  ;;  %v208_v10 = vmul.f32 %v722_v7, %v722_v7 }
  0xef   :  { %v198_v4 = vmul.f32 %v706_v63, %v706_v63  ;;  %v206_v8 = vmul.f32 %v714_v3, %v714_v3 }
  0xf2   :  { %227 = vadd.xlane.f32.xlu1 %v202_v60  ;;  %211 = vadd.xlane.f32.xlu0 %v194_v61 }
  0xf6   :  { %223 = vadd.xlane.f32.xlu1 %v200_v0  ;;  %221 = vadd.xlane.f32.xlu0 %v199_v1 }
  0xfa   :  { %219 = vadd.xlane.f32.xlu1 %v198_v4  ;;  %217 = vadd.xlane.f32.xlu0 %v197_v5 }
  0xfe   :  { %235 = vadd.xlane.f32.xlu1 %v206_v8  ;;  %233 = vadd.xlane.f32.xlu0 %v205_v9 }
 0x102   :  { %239 = vadd.xlane.f32.xlu1 %v208_v10  ;;  %237 = vadd.xlane.f32.xlu0 %v207_v11 }
 0x173   :  { %v230_v12 = vpop.xlane.xlu0 %229  ;;  %v214_v13 = vpop.xlane.xlu1 %213 }
 0x174   :  { %v243_v14 = vmax.f32 %v214_v13, 1e-24  ;;  %v251_v17 = vmax.f32 %v230_v12, 1e-24 }
 0x176   :  { %521 = vrsqrt.f32 %v243_v14 }
 0x177   :  { %v216_v15 = vpop.xlane.xlu1 %215  ;;  %v210_v16 = vpop.xlane.xlu0 %209 }
 0x178   :  { %v244_v18 = vmax.f32 %v216_v15, 1e-24  ;;  %v241_v23 = vmax.f32 %v210_v16, 1e-24 }
 0x17a   :  { %523 = vrsqrt.f32 %v244_v18 }
 0x17b   :  { %v232_v19 = vpop.xlane.xlu1 %231  ;;  %v226_v20 = vpop.xlane.xlu0 %225  ;;  %525 = vrsqrt.f32 %v251_v17 }
 0x17c   :  { %v252_v21 = vmax.f32 %v232_v19, 1e-24  ;;  %v249_v22 = vmax.f32 %v226_v20, 1e-24 }
 0x17e   :  { %527 = vrsqrt.f32 %v252_v21 }
 0x17f   :  { %v228_v24 = vpop.xlane.xlu1 %227  ;;  %v212_v25 = vpop.xlane.xlu0 %211  ;;  %529 = vrsqrt.f32 %v249_v22 }
 0x180   :  { %v250_v26 = vmax.f32 %v228_v24, 1e-24  ;;  %v242_v27 = vmax.f32 %v212_v25, 1e-24  ;;  %531 = vrsqrt.f32 %v241_v23  ;;  %v522_v28 = vpop.eup %521 }
 0x181   :  { %v275_v38 = vmul.f32 %v522_v28, %v668_v30 }
 0x182   :  { %533 = vrsqrt.f32 %v250_v26 }
 0x183   :  { %535 = vrsqrt.f32 %v242_v27  ;;  %v224_v29 = vpop.xlane.xlu1 %223  ;;  %v222_v32 = vpop.xlane.xlu0 %221 }
 0x184   :  { %v524_v33 = vpop.eup %523  ;;  %v248_v34 = vmax.f32 %v224_v29, 1e-24  ;;  %v247_v35 = vmax.f32 %v222_v32, 1e-24 }
 0x185   :  { %v276_v39 = vmul.f32 %v524_v33, %v674_v37  ;;  %v526_v40 = vpop.eup %525 }
 0x186   :  { %537 = vrsqrt.f32 %v248_v34  ;;  %v283_v49 = vmul.f32 %v526_v40, %v670_v31 }
 0x187   :  { %v437_v41 = vpack.c.bf16 %v276_v39, %v275_v38  ;;  %539 = vrsqrt.f32 %v247_v35  ;;  %v220_v44 = vpop.xlane.xlu1 %219  ;;  %v218_v45 = vpop.xlane.xlu0 %217 }
 0x188   :  { %v528_v46 = vpop.eup %527  ;;  %v246_v47 = vmax.f32 %v220_v44, 1e-24  ;;  %v245_v48 = vmax.f32 %v218_v45, 1e-24 }
 0x189   :  { %469 = vst [vmem:[#allocation2 + $0x8] sm:$0xff] %v437_v41   ;;  %v284_v50 = vmul.f32 %v528_v46, %v682_v43  ;;  %v530_v51 = vpop.eup %529 }
 0x18a   :  { %541 = vrsqrt.f32 %v246_v47  ;;  %v532_v54 = vpop.eup %531  ;;  %v281_v0 = vmul.f32 %v530_v51, %v680_v42 }
 0x18b   :  { %v457_v30 = vpack.c.bf16 %v284_v50, %v283_v49  ;;  %543 = vrsqrt.f32 %v245_v48  ;;  %v236_v37 = vpop.xlane.xlu1 %235  ;;  %v234_v55 = vpop.xlane.xlu0 %233  ;;  %v273_v31 = vmul.f32 %v532_v54, %v672_v36 }
 0x18c   :  { %v534_v56 = vpop.eup %533  ;;  %v254_v57 = vmax.f32 %v236_v37, 1e-24  ;;  %v253_v60 = vmax.f32 %v234_v55, 1e-24 }
 0x18d   :  { %v536_v61 = vpop.eup %535  ;;  %473 = vst [vmem:[#allocation2 + $0x28] sm:$0xff] %v457_v30   ;;  %v282_v1 = vmul.f32 %v534_v56, %v690_v53 }
 0x18e   :  { %v274_v43 = vmul.f32 %v536_v61, %v688_v52  ;;  %545 = vrsqrt.f32 %v254_v57 }
 0x18f   :  { %v452_v4 = vpack.c.bf16 %v282_v1, %v281_v0  ;;  %547 = vrsqrt.f32 %v253_v60  ;;  %v240_v5 = vpop.xlane.xlu1 %239  ;;  %v238_v8 = vpop.xlane.xlu0 %237 }
 0x190   :  { %v538_v9 = vpop.eup %537  ;;  %v432_v10 = vpack.c.bf16 %v274_v43, %v273_v31  ;;  %v256_v11 = vmax.f32 %v240_v5, 1e-24  ;;  %v255_v12 = vmax.f32 %v238_v8, 1e-24 }
 0x191   :  { %v540_v13 = vpop.eup %539  ;;  %472 = vst [vmem:[#allocation2 + $0x20] sm:$0xff] %v452_v4   ;;  %v280_v14 = vmul.f32 %v538_v9, %v698_v59 }
 0x192   :  { %433 = vst [vmem:[#allocation2] sm:$0xff] %v432_v10   ;;  %v279_v42 = vmul.f32 %v540_v13, %v696_v58  ;;  %549 = vrsqrt.f32 %v256_v11 }
 0x193   :  { %551 = vrsqrt.f32 %v255_v12 }
 0x194   :  { %v542_v36 = vpop.eup %541  ;;  %v447_v52 = vpack.c.bf16 %v280_v14, %v279_v42 }
 0x195   :  { %v544_v53 = vpop.eup %543  ;;  %v278_v15 = vmul.f32 %v542_v36, %v706_v63 }
 0x196   :  { %471 = vst [vmem:[#allocation2 + $0x18] sm:$0xff] %v447_v52   ;;  %v277_v16 = vmul.f32 %v544_v53, %v704_v62 }
 0x198   :  { %v546_v17 = vpop.eup %545  ;;  %v442_v18 = vpack.c.bf16 %v278_v15, %v277_v16 }
 0x199   :  { %v548_v19 = vpop.eup %547  ;;  %v286_v20 = vmul.f32 %v546_v17, %v714_v3 }
 0x19a   :  { %470 = vst [vmem:[#allocation2 + $0x10] sm:$0xff] %v442_v18   ;;  %v285_v59 = vmul.f32 %v548_v19, %v712_v2 }
 0x19c   :  { %v550_v21 = vpop.eup %549  ;;  %v462_v58 = vpack.c.bf16 %v286_v20, %v285_v59 }
 0x19d   :  { %v552_v22 = vpop.eup %551  ;;  %v288_v23 = vmul.f32 %v550_v21, %v722_v7 }
 0x19e   :  { %474 = vst [vmem:[#allocation2 + $0x30] sm:$0xff] %v462_v58   ;;  %v287_v63 = vmul.f32 %v552_v22, %v720_v6 }
 0x1a0   :  { %v467_v62 = vpack.c.bf16 %v288_v23, %v287_v63 }
 0x1a2   :  { %475 = vst [vmem:[#allocation2 + $0x38] sm:$0xff] %v467_v62  }
 0x1a3   :  { %564 = shalt.err (!%p561_p4)
}
 0x1a4   :  { %s565_s27 = scalar_lea.hbm %s763_s3, 1024 }
 0x1a5   :  { %p566_p5 = scmp.ne.s32.totalorder %s763_s3, %s565_s27  ;;  %p569_p6 = scmp.lt.u32.totalorder %s565_s27, %s763_s3 }
 0x1a7   :  { %p571_p7 = pnand %p569_p6, %p566_p5 }
 0x1a9   :  { %574 = shalt.err (!%p571_p7)
}
 0x1aa   :  { %s578_s1 = smov 64   ;;  %s579_s5 = smov 4  }
 0x1ab   :  { %380 = dma.vmem_to_hbm [thread:$0]  %s375_s2, 1024, %s763_s3, [#allocation3], %s578_s1, %s578_s1, %s579_s5  }
 0x1ac   :  { %575 = dma.done.wait [#allocation3], 1024  }
 0x1ad   :  { %576 = vsyncadd [#allocation3], 4294966272 }
 0x1ae   :  { %384 = vsyncpa [#allocation3], 1 }

</bundles_post_ra>
